<compile_context>
chip_gen: v5e
topology: v5e:2x2
jax: 0.10.0
libtpu: 0.0.40
codegen_flags: <defaults>
</compile_context>

<pallas_src>
import math
from functools import partial

import jax
import jax.numpy as jnp
from jax import lax
from jax.experimental import pallas as pl
from jax.experimental.pallas import tpu as pltpu

_SQRT_HALF = 1.0 / math.sqrt(2.0)


def _round_up(x, m):
    return (x + m - 1) // m * m


def _cdiv(a, b):
    return -(-a // b)


def _vmem_budget_bytes():
    """Generation-aware VMEM cap: physical capacity minus headroom for Mosaic
    internals.  ~54 MiB on v7x (64 MiB physical), ~100+ MiB on v5e/v6e."""
    cap = 64 << 20
    try:
        info = pltpu.get_tpu_info()
        cap = int(getattr(info, "vmem_capacity_bytes", cap)) or cap
    except Exception:
        pass
    return int(max(16 << 20, min(cap - (8 << 20), int(cap * 0.85))))


def _shrink_tile(cur, full):
    """Largest multiple of 128 that divides `full` (itself a 128-multiple) and
    is strictly smaller than `cur`; falls back to 128."""
    m = full // 128
    best = 128
    for d in range(1, m + 1):
        t = 128 * d
        if m % d == 0 and t < cur:
            best = t
    return best


def _mlp_kernel(x_ref, w1_ref, b1_ref, w2_ref, b2_ref, o_ref, acc_ref,
                *, approximate_gelu):
    """One (batch-tile i, out-tile j, hid-tile k) step of
       y = GELU(x @ W1 + b1) @ W2 + b2.
    By construction gn == 1 in the common case, so fc1 + GELU run exactly once
    per (i, k) and the w1 k-tile is streamed exactly once per batch tile."""
    k = pl.program_id(2)

    @pl.when(k == 0)
    def _():
        acc_ref[...] = jnp.zeros_like(acc_ref)

    # fc1 slice: (bb, in) @ (in, bk) -> (bb, bk); f32 accumulation on the MXU.
    h = jnp.dot(x_ref[...], w1_ref[...], preferred_element_type=jnp.float32)
    h = h + b1_ref[...].astype(jnp.float32)

    if approximate_gelu:
        # tanh/exp run on the EUP slot (essentially free while the MXU is busy).
        h = jax.nn.gelu(h, approximate=True)
    else:
        # Exact GELU: matches torch.nn.GELU() default.
        h = 0.5 * h * (1.0 + lax.erf(h * _SQRT_HALF))

    # dropout(p=0.0) is the identity.
    # TODO(synk): training-mode dropout (p > 0) needs pltpu.prng_* + masking.

    # fc2 slice: (bb, bk) @ (bk, bn), accumulated over the hid grid axis.
    acc_ref[...] += jnp.dot(h.astype(w2_ref.dtype), w2_ref[...],
                            preferred_element_type=jnp.float32)

    @pl.when(k == pl.num_programs(2) - 1)
    def _():
        o_ref[...] = (acc_ref[...]
                      + b2_ref[...].astype(jnp.float32)).astype(o_ref.dtype)


def make_mlp_forward(w1, b1, w2, b2, *, block_b=512, block_k=512,
                     param_dtype=None, approximate_gelu=False):
    """Pads/casts parameters once (outside the per-call path) and returns a
    jitted `forward(x)` implementing the fused MLP kernel."""
    param_dtype = jnp.dtype(param_dtype or w1.dtype)
    in_f, hid_f = w1.shape
    out_f = w2.shape[1]

    in_p = _round_up(in_f, 128)
    bk0 = min(block_k, _round_up(hid_f, 128))
    hid_p = _round_up(hid_f, bk0)          # pad hid up to a bk0 multiple
    out_p = _round_up(out_f, 128)          # full-width output tile by default

    # ---- pad & cast parameters ONCE -----------------------------------------
    w1p = jnp.pad(jnp.asarray(w1, param_dtype),
                  ((0, in_p - in_f), (0, hid_p - hid_f)))
    b1p = jnp.pad(jnp.reshape(jnp.asarray(b1, param_dtype), (1, -1)),
                  ((0, 0), (0, hid_p - hid_f)))
    w2p = jnp.pad(jnp.asarray(w2, param_dtype),
                  ((0, hid_p - hid_f), (0, out_p - out_f)))
    b2p = jnp.pad(jnp.reshape(jnp.asarray(b2, param_dtype), (1, -1)),
                  ((0, 0), (0, out_p - out_f)))

    budget = _vmem_budget_bytes()
    wsz = param_dtype.itemsize
    row_align = max(8, 32 // wsz)          # 8 (f32), 16 (bf16), 32 (int8/fp8)

    kernel = partial(_mlp_kernel, approximate_gelu=approximate_gelu)

    def _fits(bb, bk, bn):
        need = (2 * bb * in_p * wsz        # x tile         (double-buffered)
                + 2 * in_p * bk * wsz      # w1 tile
                + 2 * 8 * bk * wsz         # b1 tile (sublane-padded)
                + 2 * bk * bn * wsz        # w2 tile
                + 2 * 8 * bn * wsz         # b2 tile
                + 2 * bb * bn * wsz        # out tile
                + bb * bn * 4)             # f32 accumulator scratch
        return need <= budget

    @jax.jit
    def _fwd(x, w1p_, b1p_, w2p_, b2p_):
        B = x.shape[0]

        # ---- tile selection (static under jit) -------------------------------
        bb = min(block_b, _round_up(B, row_align))
        bk = bk0
        bn = out_p                         # gn == 1: no fc1 recompute
        while not _fits(bb, bk, bn):
            if bk > 128:
                bk = _shrink_tile(bk, hid_p)
            elif bb > row_align:
                bb = max(row_align, _round_up(bb // 2, row_align))
            elif bn > 128:
                bn = _shrink_tile(bn, out_p)   # last resort: re-tile out
            else:
                break

        # Keep >= 2 "parallel" grid iterations (v7x has 2 TensorCores/chip).
        if (_round_up(B, bb) // bb) * (out_p // bn) == 1 \
                and _round_up(B, row_align) >= 256:
            bb_half = _round_up(_cdiv(_round_up(B, row_align), 2), row_align)
            if _fits(bb_half, bk, bn):
                bb = bb_half

        B_p = _round_up(B, bb)
        gb, gn, gk = B_p // bb, out_p // bn, hid_p // bk

        xp = jnp.pad(jnp.asarray(x, param_dtype),
                     ((0, B_p - B), (0, in_p - in_f)))

        cost = pl.CostEstimate(
            flops=int(2 * B_p * in_p * hid_p * gn + 2 * B_p * hid_p * out_p),
            transcendentals=int(B_p * hid_p * gn),
            bytes_accessed=int(B_p * in_p * wsz
                               + gb * gn * w1p_.size * wsz
                               + gb * w2p_.size * wsz
                               + B_p * out_p * wsz),
        )

        out = pl.pallas_call(
            kernel,
            out_shape=jax.ShapeDtypeStruct((B_p, out_p), param_dtype),
            grid_spec=pltpu.PrefetchScalarGridSpec(
                num_scalar_prefetch=0,
                grid=(gb, gn, gk),
                in_specs=[
                    pl.BlockSpec((bb, in_p), lambda i, j, k: (i, 0)),   # x
                    pl.BlockSpec((in_p, bk), lambda i, j, k: (0, k)),   # w1
                    pl.BlockSpec((1, bk),    lambda i, j, k: (0, k)),   # b1
                    pl.BlockSpec((bk, bn),   lambda i, j, k: (k, j)),   # w2
                    pl.BlockSpec((1, bn),    lambda i, j, k: (0, j)),   # b2
                ],
                out_specs=pl.BlockSpec((bb, bn), lambda i, j, k: (i, j)),
                scratch_shapes=[pltpu.VMEM((bb, bn), jnp.float32)],
            ),
            compiler_params=pltpu.CompilerParams(
                dimension_semantics=("parallel", "parallel", "arbitrary"),
                vmem_limit_bytes=budget),
            cost_estimate=cost,
        )(xp, w1p_, b1p_, w2p_, b2p_)

        return out[:B, :out_f]

    def forward(x):
        return _fwd(x, w1p, b1p, w2p, b2p)

    return forward


def mlp_forward(x, w1, b1, w2, b2, **kwargs):
    """One-shot convenience wrapper (prefer make_mlp_forward for reuse)."""
    return make_mlp_forward(w1, b1, w2, b2, **kwargs)(x)


# ----------------------------------------------------------------------------
# Reference & test harness
# ----------------------------------------------------------------------------
def init_mlp_params(key, in_features, hidden_features, out_features,
                    dtype=jnp.float32):
    """Deterministic init mimicking nn.Linear default (uniform +-1/sqrt(fan_in)),
    stored transposed: w1 (in, hid), w2 (hid, out)."""
    k1, k2, k3, k4 = jax.random.split(key, 4)
    lim1 = 1.0 / math.sqrt(in_features)
    lim2 = 1.0 / math.sqrt(hidden_features)
    w1 = jax.random.uniform(k1, (in_features, hidden_features), dtype, -lim1, lim1)
    b1 = jax.random.uniform(k2, (1, hidden_features), dtype, -lim1, lim1)
    w2 = jax.random.uniform(k3, (hidden_features, out_features), dtype, -lim2, lim2)
    b2 = jax.random.uniform(k4, (1, out_features), dtype, -lim2, lim2)
    return w1, b1, w2, b2


def mlp_reference(x, w1, b1, w2, b2):
    h = x @ w1 + b1
    h = 0.5 * h * (1.0 + lax.erf(h * _SQRT_HALF))
    return h @ w2 + b2


def _check_case(key, B, in_f, hid_f, out_f):
    kx, kp = jax.random.split(key)
    x = jax.random.normal(kx, (B, in_f), jnp.float32)
    w1, b1, w2, b2 = init_mlp_params(kp, in_f, hid_f, out_f)
    fwd = make_mlp_forward(w1, b1, w2, b2)
    out = jax.block_until_ready(fwd(x))
    ref = mlp_reference(x, w1, b1, w2, b2)
    assert out.shape == (B, out_f), out.shape
    max_diff = float(jnp.max(jnp.abs(out - ref)))
    assert jnp.allclose(out, ref, atol=1e-2, rtol=1e-2), max_diff


if __name__ == "__main__":
    key = jax.random.PRNGKey(0)
    k1, k2, k3 = jax.random.split(key, 3)

    # Case 1: small, "nice" shapes.
    _check_case(k1, B=8, in_f=32, hid_f=64, out_f=32)

    # Case 2: ragged shapes (exercises padding of batch and feature dims).
    _check_case(k2, B=20, in_f=48, hid_f=96, out_f=40)

    # Case 3: multi-k-tile accumulation (hid padded to 2x bk) + batch-tile split.
    _check_case(k3, B=300, in_f=256, hid_f=640, out_f=192)

    print("KERNEL_OK")
</pallas_src>

<mosaic_0001>
module attributes {stable_mosaic.version = 11 : i64} {
  func.func @_mlp_kernel(%arg0: i32, %arg1: i32, %arg2: i32, %arg3: memref<8x128xf32, #tpu.memory_space<vmem>>, %arg4: memref<128x128xf32, #tpu.memory_space<vmem>>, %arg5: memref<1x128xf32, #tpu.memory_space<vmem>>, %arg6: memref<128x128xf32, #tpu.memory_space<vmem>>, %arg7: memref<1x128xf32, #tpu.memory_space<vmem>>, %arg8: memref<8x128xf32, #tpu.memory_space<vmem>>, %arg9: memref<8x128xf32, #tpu.memory_space<vmem>>) attributes {dimension_semantics = [#tpu.dimension_semantics<parallel>, #tpu.dimension_semantics<parallel>, #tpu.dimension_semantics<arbitrary>], iteration_bounds = array<i64: 1, 1, 1>, scalar_prefetch = 0 : i64, scratch_operands = 1 : i64, tpu.core_type = #tpu.core_type<tc>, window_params = [{transform_indices = @transform_0, window_bounds = array<i64: 8, 128>}, {transform_indices = @transform_1, window_bounds = array<i64: 128, 128>}, {transform_indices = @transform_2, window_bounds = array<i64: 1, 128>}, {transform_indices = @transform_3, window_bounds = array<i64: 128, 128>}, {transform_indices = @transform_4, window_bounds = array<i64: 1, 128>}, {transform_indices = @transform_5, window_bounds = array<i64: 8, 128>}]} {
    %c0_i32 = arith.constant 0 : i32
    %0 = arith.cmpi eq, %arg2, %c0_i32 : i32
    %1 = arith.extui %0 : i1 to i32
    %c0_i32_0 = arith.constant 0 : i32
    %2 = arith.cmpi ne, %1, %c0_i32_0 : i32
    scf.if %2 {
      %cst_18 = arith.constant 0.000000e+00 : f32
      %25 = vector.broadcast %cst_18 : f32 to vector<8x128xf32>
      %c0_19 = arith.constant 0 : index
      %c0_20 = arith.constant 0 : index
      %26 = vector.load %arg9[%c0_19, %c0_20] : memref<8x128xf32, #tpu.memory_space<vmem>>, vector<8x128xf32>
      tpu.vector_store %arg9[%c0_19, %c0_20], %25 {strides = array<i32>} : memref<8x128xf32, #tpu.memory_space<vmem>>, vector<8x128xf32>,
    } else {
    }
    %c0 = arith.constant 0 : index
    %c0_1 = arith.constant 0 : index
    %3 = vector.load %arg3[%c0, %c0_1] : memref<8x128xf32, #tpu.memory_space<vmem>>, vector<8x128xf32>
    %c0_2 = arith.constant 0 : index
    %c0_3 = arith.constant 0 : index
    %4 = vector.load %arg4[%c0_2, %c0_3] : memref<128x128xf32, #tpu.memory_space<vmem>>, vector<128x128xf32>
    %cst = arith.constant dense<0.000000e+00> : vector<8x128xf32>
    %5 = tpu.matmul %3, %4, %cst {dimension_numbers = #tpu.dot_dimension_numbers<[1], [0], [0], [1], [0, 0, 1, 1], [], []>} : vector<8x128xf32>, vector<128x128xf32>, vector<8x128xf32> -> vector<8x128xf32>
    %c0_4 = arith.constant 0 : index
    %c0_5 = arith.constant 0 : index
    %6 = vector.load %arg5[%c0_4, %c0_5] : memref<1x128xf32, #tpu.memory_space<vmem>>, vector<1x128xf32>
    %7 = vector.broadcast %6 : vector<1x128xf32> to vector<8x128xf32>
    %8 = arith.addf %5, %7 : vector<8x128xf32>
    %cst_6 = arith.constant 5.000000e-01 : f32
    %9 = vector.broadcast %cst_6 : f32 to vector<8x128xf32>
    %10 = arith.mulf %9, %8 : vector<8x128xf32>
    %cst_7 = arith.constant 0.707106769 : f32
    %11 = vector.broadcast %cst_7 : f32 to vector<8x128xf32>
    %12 = arith.mulf %8, %11 : vector<8x128xf32>
    %13 = math.erf %12 : vector<8x128xf32>
    %cst_8 = arith.constant 1.000000e+00 : f32
    %14 = vector.broadcast %cst_8 : f32 to vector<8x128xf32>
    %15 = arith.addf %14, %13 : vector<8x128xf32>
    %16 = arith.mulf %10, %15 : vector<8x128xf32>
    %c0_9 = arith.constant 0 : index
    %c0_10 = arith.constant 0 : index
    %17 = vector.load %arg9[%c0_9, %c0_10] : memref<8x128xf32, #tpu.memory_space<vmem>>, vector<8x128xf32>
    %c0_11 = arith.constant 0 : index
    %c0_12 = arith.constant 0 : index
    %18 = vector.load %arg6[%c0_11, %c0_12] : memref<128x128xf32, #tpu.memory_space<vmem>>, vector<128x128xf32>
    %cst_13 = arith.constant dense<0.000000e+00> : vector<8x128xf32>
    %19 = tpu.matmul %16, %18, %cst_13 {dimension_numbers = #tpu.dot_dimension_numbers<[1], [0], [0], [1], [0, 0, 1, 1], [], []>} : vector<8x128xf32>, vector<128x128xf32>, vector<8x128xf32> -> vector<8x128xf32>
    %20 = arith.addf %17, %19 : vector<8x128xf32>
    %c0_14 = arith.constant 0 : index
    %c0_15 = arith.constant 0 : index
    %21 = vector.load %arg9[%c0_14, %c0_15] : memref<8x128xf32, #tpu.memory_space<vmem>>, vector<8x128xf32>
    tpu.vector_store %arg9[%c0_14, %c0_15], %20 {strides = array<i32>} : memref<8x128xf32, #tpu.memory_space<vmem>>, vector<8x128xf32>,
    %c0_i32_16 = arith.constant 0 : i32
    %22 = arith.cmpi eq, %arg2, %c0_i32_16 : i32
    %23 = arith.extui %22 : i1 to i32
    %c0_i32_17 = arith.constant 0 : i32
    %24 = arith.cmpi ne, %23, %c0_i32_17 : i32
    scf.if %24 {
      %c0_18 = arith.constant 0 : index
      %c0_19 = arith.constant 0 : index
      %25 = vector.load %arg9[%c0_18, %c0_19] : memref<8x128xf32, #tpu.memory_space<vmem>>, vector<8x128xf32>
      %c0_20 = arith.constant 0 : index
      %c0_21 = arith.constant 0 : index
      %26 = vector.load %arg7[%c0_20, %c0_21] : memref<1x128xf32, #tpu.memory_space<vmem>>, vector<1x128xf32>
      %27 = vector.broadcast %26 : vector<1x128xf32> to vector<8x128xf32>
      %28 = arith.addf %25, %27 : vector<8x128xf32>
      %c0_22 = arith.constant 0 : index
      %c0_23 = arith.constant 0 : index
      %29 = vector.load %arg8[%c0_22, %c0_23] : memref<8x128xf32, #tpu.memory_space<vmem>>, vector<8x128xf32>
      tpu.vector_store %arg8[%c0_22, %c0_23], %28 {strides = array<i32>} : memref<8x128xf32, #tpu.memory_space<vmem>>, vector<8x128xf32>,
    } else {
    }
    return
  }
  func.func @transform_0(%arg0: i32, %arg1: i32, %arg2: i32) -> (i32, i32) {
    %c0_i32 = arith.constant 0 : i32
    %c0_i32_0 = arith.constant 0 : i32
    return %arg0, %c0_i32 : i32, i32
  }
  func.func @transform_1(%arg0: i32, %arg1: i32, %arg2: i32) -> (i32, i32) {
    %c0_i32 = arith.constant 0 : i32
    %c0_i32_0 = arith.constant 0 : i32
    return %c0_i32, %arg2 : i32, i32
  }
  func.func @transform_2(%arg0: i32, %arg1: i32, %arg2: i32) -> (i32, i32) {
    %c0_i32 = arith.constant 0 : i32
    %c0_i32_0 = arith.constant 0 : i32
    return %c0_i32, %arg2 : i32, i32
  }
  func.func @transform_3(%arg0: i32, %arg1: i32, %arg2: i32) -> (i32, i32) {
    %c0_i32 = arith.constant 0 : i32
    return %arg2, %arg1 : i32, i32
  }
  func.func @transform_4(%arg0: i32, %arg1: i32, %arg2: i32) -> (i32, i32) {
    %c0_i32 = arith.constant 0 : i32
    %c0_i32_0 = arith.constant 0 : i32
    return %c0_i32, %arg1 : i32, i32
  }
  func.func @transform_5(%arg0: i32, %arg1: i32, %arg2: i32) -> (i32, i32) {
    %c0_i32 = arith.constant 0 : i32
    return %arg0, %arg1 : i32, i32
  }
}

</mosaic_0001>

<bundles_post_ra>
// kernel: _fwd.1
= control target key start
LH: loop header
LB: loop body
LE: loop exit
PB: predicated region body
PF: predicated region fallthrough
CT: control target
= control target key end

     0   :  { %10 = vsyncpa [#allocation4], 0  ;;  %s351_s0 = inlined_call_operand.vmem [shape: f32[8,128], index: 0, kind: input, shape index: {}]   ;;  %s352_s1 = inlined_call_operand.hbm [shape: f32[128,128], index: 1, kind: input, shape index: {}]   ;;  %s353_s2 = inlined_call_operand.vmem [shape: f32[1,128], index: 2, kind: input, shape index: {}]   ;;  %s354_s3 = inlined_call_operand.hbm [shape: f32[128,128], index: 3, kind: input, shape index: {}]   ;;  %s355_s4 = inlined_call_operand.vmem [shape: f32[1,128], index: 4, kind: input, shape index: {}]   ;;  %s356_s5 = inlined_call_operand.hbm [shape: f32[8,128], index: 5, kind: output, shape index: {}]  }
   0x1   :  { %11 = vsyncpa [#allocation7], 0 }
   0x2   :  { %12 = vsyncpa [#allocation5], 0  ;;  %s19_s20 = sshll.u32 %s352_s1, 4  ;;  %s298_s21 = smov [#allocation3]   ;;  %s20_s20 = int_to_ptr.hbm [resolvable:$true] %s19_s20 }
   0x3   :  { %s21_s22 = sshll.u32 %s298_s21, 4  ;;  %s34_s25 = sshll.u32 %s354_s3, 4  ;;  %s22_s22 = int_to_ptr.vmem [resolvable:$true] %s21_s22  ;;  %s35_s25 = int_to_ptr.hbm [resolvable:$true] %s34_s25 }
   0x4   :  { %s299_s26 = smov 128   ;;  %s300_s27 = smov 8  }
   0x5   :  { %27 = dma.hbm_to_vmem [thread:$0]  %s20_s20, 2048, %s22_s22, [#allocation4], %s299_s26, %s299_s26, %s300_s27  }
   0x6   :  { %s301_s28 = smov [#allocation6]  }
   0x7   :  { %s36_s29 = sshll.u32 %s301_s28, 4  ;;  %s37_s29 = int_to_ptr.vmem [resolvable:$true] %s36_s29 }
   0x8   :  { %42 = dma.hbm_to_vmem [thread:$0]  %s35_s25, 2048, %s37_s29, [#allocation7], %s299_s26, %s299_s26, %s300_s27  }
   0x9   :  { %292 = dma.done.wait [#allocation4], 2048  }
   0xa   :  { %293 = vsyncadd [#allocation4], 4294965248 }
   0xb   :  { %294 = dma.done.wait [#allocation7], 2048  }
   0xc   :  { %295 = vsyncadd [#allocation7], 4294965248  ;;  %v74_v0 = vld [vmem:[#allocation3 + $0x78] sm:$0xff]  ;;  %v73_v1 = vld [vmem:[#allocation3 + $0x70] sm:$0xff]  ;;  %s302_s7 = smov [#allocation8]   ;;  %s199_s11 = sshll.u32 %s356_s5, 4  ;;  %s200_s11 = int_to_ptr.hbm [resolvable:$true] %s199_s11 }
   0xd   :  { %79 = vmatpush.msra.mxu0 %v74_v0  ;;  %v72_v2 = vld [vmem:[#allocation3 + $0x68] sm:$0xff]  ;;  %v71_v3 = vld [vmem:[#allocation3 + $0x60] sm:$0xff]  ;;  %v70_v4 = vld [vmem:[#allocation3 + $0x58] sm:$0xff]  ;;  %s197_s8 = sshll.u32 %s302_s7, 4  ;;  %s198_s8 = int_to_ptr.vmem [resolvable:$true] %s197_s8 }
   0xe   :  { %v69_v5 = vld [vmem:[#allocation3 + $0x50] sm:$0xff]  ;;  %v68_v6 = vld [vmem:[#allocation3 + $0x48] sm:$0xff]  ;;  %v67_v7 = vld [vmem:[#allocation3 + $0x40] sm:$0xff] }
   0xf   :  { %80 = vmatpush.msra.mxu0 %v73_v1  ;;  %v66_v8 = vld [vmem:[#allocation3 + $0x38] sm:$0xff]  ;;  %v65_v9 = vld [vmem:[#allocation3 + $0x30] sm:$0xff]  ;;  %v64_v10 = vld [vmem:[#allocation3 + $0x28] sm:$0xff] }
  0x10   :  { %v63_v11 = vld [vmem:[#allocation3 + $0x20] sm:$0xff]  ;;  %v62_v12 = vld [vmem:[#allocation3 + $0x18] sm:$0xff]  ;;  %v61_v13 = vld [vmem:[#allocation3 + $0x10] sm:$0xff] }
  0x11   :  { %81 = vmatpush.msra.mxu0 %v72_v2  ;;  %v60_v14 = vld [vmem:[#allocation3 + $0x8] sm:$0xff]  ;;  %v59_v15 = vld [vmem:[#allocation3] sm:$0xff]  ;;  %v159_v17 = vld [vmem:[#allocation6 + $0x78] sm:$0xff] }
  0x12   :  { %v58_v16 = vld [vmem:[%s351_s0] sm:$0xff]  ;;  %160 = vmatpush.msra.mxu1 %v159_v17  ;;  %v158_v18 = vld [vmem:[#allocation6 + $0x70] sm:$0xff]  ;;  %v157_v19 = vld [vmem:[#allocation6 + $0x68] sm:$0xff] }
  0x13   :  { %82 = vmatpush.msra.mxu0 %v71_v3  ;;  %v156_v20 = vld [vmem:[#allocation6 + $0x60] sm:$0xff]  ;;  %v155_v22 = vld [vmem:[#allocation6 + $0x58] sm:$0xff]  ;;  %v154_v23 = vld [vmem:[#allocation6 + $0x50] sm:$0xff] }
  0x14   :  { %161 = vmatpush.msra.mxu1 %v158_v18  ;;  %v216_v21 = vld [vmem:[%s353_s2] ss:$0 sm:$0xff]  ;;  %v153_v25 = vld [vmem:[#allocation6 + $0x48] sm:$0xff]  ;;  %v151_v29 = vld [vmem:[#allocation6 + $0x38] sm:$0xff] }
  0x15   :  { %83 = vmatpush.msra.mxu0 %v70_v4  ;;  %v152_v27 = vld [vmem:[#allocation6 + $0x40] sm:$0xff]  ;;  %v150_v31 = vld [vmem:[#allocation6 + $0x30] sm:$0xff]  ;;  %v149_v33 = vld [vmem:[#allocation6 + $0x28] sm:$0xff] }
  0x16   :  { %162 = vmatpush.msra.mxu1 %v157_v19  ;;  %v148_v36 = vld [vmem:[#allocation6 + $0x20] sm:$0xff]  ;;  %v147_v39 = vld [vmem:[#allocation6 + $0x18] sm:$0xff]  ;;  %v146_v42 = vld [vmem:[#allocation6 + $0x10] sm:$0xff] }
  0x17   :  { %84 = vmatpush.msra.mxu0 %v69_v5  ;;  %v145_v45 = vld [vmem:[#allocation6 + $0x8] sm:$0xff]  ;;  %v144_v47 = vld [vmem:[#allocation6] sm:$0xff] }
  0x18   :  { %163 = vmatpush.msra.mxu1 %v156_v20 }
  0x19   :  { %85 = vmatpush.msra.mxu0 %v68_v6 }
  0x1a   :  { %164 = vmatpush.msra.mxu1 %v155_v22 }
  0x1b   :  { %86 = vmatpush.msra.mxu0 %v67_v7 }
  0x1c   :  { %165 = vmatpush.msra.mxu1 %v154_v23 }
  0x1d   :  { %87 = vmatpush.msra.mxu0 %v66_v8 }
  0x1e   :  { %166 = vmatpush.msra.mxu1 %v153_v25 }
  0x1f   :  { %88 = vmatpush.msra.mxu0 %v65_v9 }
  0x20   :  { %167 = vmatpush.msra.mxu1 %v152_v27 }
  0x21   :  { %89 = vmatpush.msra.mxu0 %v64_v10 }
  0x22   :  { %168 = vmatpush.msra.mxu1 %v151_v29 }
  0x23   :  { %90 = vmatpush.msra.mxu0 %v63_v11  ;;  %v217_v11 = vld [vmem:[%s355_s4] ss:$0 sm:$0xff] }
  0x24   :  { %169 = vmatpush.msra.mxu1 %v150_v31 }
  0x25   :  { %91 = vmatpush.msra.mxu0 %v62_v12 }
  0x26   :  { %170 = vmatpush.msra.mxu1 %v149_v33 }
  0x27   :  { %92 = vmatpush.msra.mxu0 %v61_v13 }
  0x28   :  { %171 = vmatpush.msra.mxu1 %v148_v36 }
  0x29   :  { %93 = vmatpush.msra.mxu0 %v60_v14 }
  0x2a   :  { %172 = vmatpush.msra.mxu1 %v147_v39 }
  0x2b   :  { %94 = vmatpush.msra.mxu0 %v59_v15 }
  0x2c   :  { %95 = vmatmul.f32.vlgmr.msra.gmra.mxu0 %v58_v16  ;;  %173 = vmatpush.msra.mxu1 %v146_v42 }
  0x2e   :  { %174 = vmatpush.msra.mxu1 %v145_v45 }
  0x30   :  { %175 = vmatpush.msra.mxu1 %v144_v47 }
  0xa9   :  { %v96_v24 = vpop.f32.mrf.mxu0 }
  0xaa   :  { %v97_v26 = vadd.f32 %v216_v21, %v96_v24 }
  0xac   :  { %v100_v28 = vmul.f32 0.70710677, %v97_v26  ;;  %v99_v8 = vmul.f32 0.5, %v97_v26 }
  0xae   :  { %v101_v30 = vmul.f32 %v100_v28, %v100_v28 }
  0xb0   :  { %v102_v32 = vmin.f32 %v101_v30, 16.0 }
  0xb2   :  { %v103_v34 = vmul.f32 2.1237322e-06, %v102_v32  ;;  %v114_v35 = vmul.f32 3.8918573e-05, %v102_v32 }
  0xb4   :  { %v104_v37 = vadd.f32 0.00028619796, %v103_v34  ;;  %v115_v38 = vadd.f32 0.001143296, %v114_v35 }
  0xb6   :  { %v105_v40 = vmul.f32 %v104_v37, %v102_v32  ;;  %v116_v41 = vmul.f32 %v115_v38, %v102_v32 }
  0xb8   :  { %v117_v43 = vadd.f32 0.014752088, %v116_v41  ;;  %v106_v44 = vadd.f32 0.0036580483, %v105_v40 }
  0xba   :  { %v118_v46 = vmul.f32 %v117_v43, %v102_v32  ;;  %v107_v49 = vmul.f32 %v106_v44, %v102_v32 }
  0xbc   :  { %v119_v48 = vadd.f32 0.112945676, %v118_v46  ;;  %v108_v52 = vadd.f32 0.05243302, %v107_v49 }
  0xbe   :  { %v120_v50 = vmul.f32 %v119_v48, %v102_v32  ;;  %v109_v55 = vmul.f32 %v108_v52, %v102_v32 }
  0xc0   :  { %v121_v51 = vadd.f32 0.4994258, %v120_v50  ;;  %v110_v56 = vadd.f32 0.18741608, %v109_v55 }
  0xc2   :  { %v122_v53 = vmul.f32 %v121_v51, %v102_v32  ;;  %v111_v58 = vmul.f32 %v110_v56, %v102_v32 }
  0xc4   :  { %v123_v54 = vadd.f32 1.0, %v122_v53  ;;  %v112_v62 = vadd.f32 1.1283791, %v111_v58 }
  0xc6   :  { %218 = vrcp.f32 %v123_v54  ;;  %v135_v61 = vand.u32 2147483648, %v123_v54  ;;  %v133_v0 = vand.u32 2147483647, %v123_v54  ;;  %vm129_vm1 = vweird.f32 %v123_v54 }
  0xc7   :  { %v113_v3 = vmul.f32 %v112_v62, %v100_v28 }
  0xc8   :  { %v136_v2 = vor.u32 1.1754944e-38, %v135_v61  ;;  %vm134_vm3 = vcmp.eq.f32.partialorder %v133_v0, 8.507059e+37 }
  0xcc   :  { %v219_v57 = vpop.eup %218 }
  0xcd   :  { %v125_v59 = vmul.f32 %v219_v57, %v123_v54  ;;  %vm130_vm0 = vweird.f32 %v219_v57 }
  0xce   :  { %vm131_vm2 = vmor %vm129_vm1, %vm130_vm0 }
  0xcf   :  { %v126_v60 = vsub.f32 1.0, %v125_v59 }
  0xd1   :  { %v127_v63 = vmul.f32 %v219_v57, %v126_v60 }
  0xd3   :  { %v128_v1 = vadd.f32 %v219_v57, %v127_v63 }
  0xd5   :  { %v132_v4 = vsel %vm131_vm2, %v219_v57, %v128_v1 }
  0xd6   :  { %v137_v5 = vsel %vm134_vm3, %v136_v2, %v132_v4 }
  0xd7   :  { %v138_v6 = vmul.f32 %v137_v5, %v113_v3 }
  0xd9   :  { %v210_v7 = vclamps-f32 %v138_v6, 1.0 }
  0xdb   :  { %v141_v9 = vadd.f32 1.0, %v210_v7 }
  0xdd   :  { %v142_v10 = vmul.f32 %v141_v9, %v99_v8 }
  0xdf   :  { %176 = vmatmul.f32.vlgmr.msra.gmra.mxu1 %v142_v10 }
 0x15c   :  { %v177_v12 = vpop.f32.mrf.mxu1 }
 0x15d   :  { %v190_v13 = vadd.f32 %v217_v11, %v177_v12 }
 0x15f   :  { %191 = vst [vmem:[#allocation8] sm:$0xff] %v190_v13 }
 0x160   :  { %202 = dma.vmem_to_hbm [thread:$0]  %s198_s8, 128, %s200_s11, [#allocation5]  }
 0x161   :  { %296 = dma.done.wait [#allocation5], 128  }
 0x162   :  { %297 = vsyncadd [#allocation5], 4294967168 }
 0x163   :  { %207 = vsyncpa [#allocation4], 1 }
 0x164   :  { %208 = vsyncpa [#allocation7], 1 }
 0x165   :  { %209 = vsyncpa [#allocation5], 1 }

</bundles_post_ra>
